<compile_context>
chip_gen: v7x
topology: tpu7x:2x2x1
jax: 0.10.0
libtpu: 0.0.40
codegen_flags: <defaults>
</compile_context>

<pallas_src>
import functools

import jax
import jax.numpy as jnp
from jax import lax
from jax.experimental import pallas as pl
from jax.experimental.pallas import tpu as pltpu

_EPS = 1e-6  # F.pairwise_distance default eps


def _round_up(x, m):
    return ((x + m - 1) // m) * m


def _vmem_capacity_bytes():
    """Physical VMEM per TensorCore; conservative 64 MiB (v7x-class) fallback."""
    try:
        cap = getattr(pltpu.get_tpu_info(), "vmem_capacity_bytes", None)
        if cap:
            return int(cap)
    except Exception:
        pass
    return 64 * 1024 * 1024


def _contrastive_kernel(margin, total_rows, need_mask, use_mxu_reduce, *refs):
    """One row-tile -> one (8,128) vreg holding the tile's partial loss sum.

    refs = (x1, x2, label[, rmat], out).  x1/x2 are (tb, W); label is (tb, G)
    where G original rows are packed into each 128-lane row (G == 1 in the
    generic path).  rmat is the (W, G) block-of-ones segment-sum matrix
    (packed path only).
    """
    if use_mxu_reduce:
        x1_ref, x2_ref, label_ref, rmat_ref, out_ref = refs
    else:
        x1_ref, x2_ref, label_ref, out_ref = refs

    tb = x1_ref.shape[0]
    g = label_ref.shape[1]

    x1 = x1_ref[...].astype(jnp.float32)      # (tb, W) upcast on the VPU
    x2 = x2_ref[...].astype(jnp.float32)      # (tb, W)
    lbl = label_ref[...]                      # (tb, G), already f32

    diff = x1 - x2 + _EPS                     # eps elementwise == F.pairwise_distance
    sq = diff * diff
    if use_mxu_reduce:
        # MXU segment-sum: column j of rmat sums lanes [j*D, (j+1)*D).
        # HIGHEST => fp32 contraction (exact); the MXU is otherwise idle.
        d_sq = jnp.dot(sq, rmat_ref[...],
                       preferred_element_type=jnp.float32,
                       precision=lax.Precision.HIGHEST)       # (tb, G)
    else:
        d_sq = jnp.sum(sq, axis=-1, keepdims=True)            # (tb, 1)

    d = jnp.sqrt(d_sq)                                         # EUP
    hinge = jnp.maximum(margin - d, 0.0)
    per_row = lbl * d_sq + (1.0 - lbl) * hinge * hinge         # (tb, G)

    if need_mask:
        # Drop rows beyond the true batch in the (Pallas-padded) last tile.
        # jnp.where is a select, so garbage/NaN in padded rows never propagates.
        r = pl.program_id(0) * tb + lax.broadcasted_iota(jnp.int32, per_row.shape, 0)
        c = lax.broadcasted_iota(jnp.int32, per_row.shape, 1)
        per_row = jnp.where(r * g + c < total_rows, per_row, 0.0)

    # One dense vreg per tile: a single unmasked, fully (8,128)-aligned store.
    out_ref[...] = jnp.full((1, 8, 128), jnp.sum(per_row), dtype=jnp.float32)


def contrastive_loss(output1, output2, label, margin=1.0, block_rows=None):
    """output1, output2: (B, D); label: (B,) or (B, 1).  Returns scalar f32."""
    B, D = output1.shape
    itemsize = jnp.dtype(output1.dtype).itemsize

    # --- Lane-dense repack (free, contiguous reshape) for narrow D. ----------
    if D < 128 and 128 % D == 0 and B % (128 // D) == 0:
        g = 128 // D                  # original rows per packed 128-lane row
    else:
        g = 1
    w = D * g
    rows = B // g
    x1 = output1.reshape(rows, w)
    x2 = output2.reshape(rows, w)
    lbl = label.reshape(rows, g).astype(jnp.float32)
    use_mxu_reduce = g > 1

    # --- Generation-aware, byte-budgeted tile rows (no hard row cap). --------
    w_pad = _round_up(w, 128)                      # lane padding in VMEM
    row_in_vmem = w_pad * itemsize                 # one input array, one row
    row_lbl_vmem = 128 * 4                         # label row lane-pads to 128
    per_row_live = 2 * (2 * row_in_vmem + row_lbl_vmem)   # 2-deep pipeline

    cap = _vmem_capacity_bytes()
    live_target = max(8 << 20, cap // 4)           # ~16 MiB (v7x) / 32 MiB (v5e/v6e)

    if block_rows is None:
        tb = max(8, ((live_target // per_row_live) // 8) * 8)
    else:
        tb = max(1, int(block_rows))               # callers should pass a multiple of 8
    if rows <= tb:
        if rows >= 16:
            # Keep >= 2 grid steps so v7x's second TensorCore participates.
            tb = _round_up(pl.cdiv(rows, 2), 8)
        else:
            tb = rows                              # single full-extent block
    num_tiles = pl.cdiv(rows, tb)
    need_mask = (rows % tb) != 0

    live_bytes = per_row_live * tb + (2 << 20)     # + rmat/out blocks + slack
    vmem_limit = int(min(max(32 << 20, live_bytes + (4 << 20)), (cap * 3) // 4))
    vmem_limit = max(vmem_limit, live_bytes)

    # --- Kernel launch. -------------------------------------------------------
    in_specs = [
        pl.BlockSpec((tb, w), lambda i: (i, 0)),
        pl.BlockSpec((tb, w), lambda i: (i, 0)),
        pl.BlockSpec((tb, g), lambda i: (i, 0)),
    ]
    args = [x1, x2, lbl]
    if use_mxu_reduce:
        # Block-diagonal ones (W, G): column j sums lanes [j*D, (j+1)*D).
        # Constant block index -> DMA'd once and kept resident in VMEM.
        rmat = (jnp.arange(w)[:, None] // D ==
                jnp.arange(g)[None, :]).astype(jnp.float32)
        in_specs.append(pl.BlockSpec((w, g), lambda i: (0, 0)))
        args.append(rmat)

    kernel = functools.partial(_contrastive_kernel, float(margin), B,
                               need_mask, use_mxu_reduce)

    partial_sums = pl.pallas_call(
        kernel,
        out_shape=jax.ShapeDtypeStruct((num_tiles, 8, 128), jnp.float32),
        grid=(num_tiles,),
        in_specs=in_specs,
        out_specs=pl.BlockSpec((1, 8, 128), lambda i: (i, 0, 0)),
        compiler_params=pltpu.CompilerParams(
            dimension_semantics=("parallel",),
            vmem_limit_bytes=vmem_limit,
        ),
        cost_estimate=pl.CostEstimate(
            flops=B * (3 * D + 10) + 2 * rows * w * g,
            transcendentals=B,
            bytes_accessed=2 * B * D * itemsize + B * 4 + num_tiles * 8 * 128 * 4,
        ),
    )(*args)

    return jnp.sum(partial_sums[:, 0, 0]) / B


def contrastive_loss_ref(output1, output2, label, margin=1.0):
    # Pure-JAX reference (mirrors the PyTorch module).
    d = jnp.linalg.norm(
        output1.astype(jnp.float32) - output2.astype(jnp.float32) + _EPS, axis=-1)
    hinge = jnp.maximum(margin - d, 0.0)
    lbl = label.reshape(-1).astype(jnp.float32)
    return jnp.mean(lbl * d**2 + (1.0 - lbl) * hinge**2)


if __name__ == "__main__":
    def run_case(b, d, dtype, block_rows=None, seed=0):
        k1, k2, k3 = jax.random.split(jax.random.PRNGKey(seed), 3)
        x1 = jax.random.normal(k1, (b, d), dtype=jnp.float32).astype(dtype)
        x2 = jax.random.normal(k2, (b, d), dtype=jnp.float32).astype(dtype)
        lbl = jax.random.bernoulli(k3, 0.5, (b,)).astype(jnp.float32)
        got = jax.block_until_ready(
            contrastive_loss(x1, x2, lbl, margin=1.0, block_rows=block_rows))
        ref = contrastive_loss_ref(x1, x2, lbl, margin=1.0)
        assert jnp.allclose(got, ref, rtol=2e-5, atol=2e-5), (b, d, dtype, got, ref)

    # Small shapes consistent with the module: batch=8, feature dim=32.
    # Packed lane-dense path (4 original rows per 128-lane row), single tile.
    run_case(8, 32, jnp.float32, seed=0)
    # Packed path, multi-tile with ragged (masked) last tile.
    run_case(40, 32, jnp.float32, block_rows=8, seed=1)
    # Generic path (D does not divide 128), multi-tile with ragged last tile.
    run_case(20, 96, jnp.float32, block_rows=8, seed=2)
    # bf16 inputs through the packed path (upcast happens inside the kernel).
    run_case(32, 64, jnp.bfloat16, seed=3)

    print("KERNEL_OK")
</pallas_src>

<mosaic_0001>
module attributes {stable_mosaic.version = 11 : i64} {
  func.func @_contrastive_kernel(%arg0: i32, %arg1: memref<2x128xf32, #tpu.memory_space<vmem>>, %arg2: memref<2x128xf32, #tpu.memory_space<vmem>>, %arg3: memref<2x4xf32, #tpu.memory_space<vmem>>, %arg4: memref<128x4xf32, #tpu.memory_space<vmem>>, %arg5: memref<1x8x128xf32, #tpu.memory_space<vmem>>) attributes {dimension_semantics = [#tpu.dimension_semantics<parallel>], iteration_bounds = array<i64: 1>, scalar_prefetch = 0 : i64, scratch_operands = 0 : i64, tpu.core_type = #tpu.core_type<tc>, window_params = [{transform_indices = @transform_0, window_bounds = array<i64: 2, 128>}, {transform_indices = @transform_1, window_bounds = array<i64: 2, 128>}, {transform_indices = @transform_2, window_bounds = array<i64: 2, 4>}, {pipeline_mode = #tpu.pipeline_mode<synchronous>, transform_indices = @transform_3, window_bounds = array<i64: 128, 4>}, {transform_indices = @transform_4, window_bounds = array<i64: 1, 8, 128>}]} {
    %c0 = arith.constant 0 : index
    %c0_0 = arith.constant 0 : index
    %0 = vector.load %arg1[%c0, %c0_0] : memref<2x128xf32, #tpu.memory_space<vmem>>, vector<2x128xf32>
    %c0_1 = arith.constant 0 : index
    %c0_2 = arith.constant 0 : index
    %1 = vector.load %arg2[%c0_1, %c0_2] : memref<2x128xf32, #tpu.memory_space<vmem>>, vector<2x128xf32>
    %c0_3 = arith.constant 0 : index
    %c0_4 = arith.constant 0 : index
    %2 = vector.load %arg3[%c0_3, %c0_4] : memref<2x4xf32, #tpu.memory_space<vmem>>, vector<2x4xf32>
    %3 = arith.subf %0, %1 : vector<2x128xf32>
    %cst = arith.constant 9.99999997E-7 : f32
    %4 = vector.broadcast %cst : f32 to vector<2x128xf32>
    %5 = arith.addf %3, %4 : vector<2x128xf32>
    %6 = arith.mulf %5, %5 : vector<2x128xf32>
    %c0_5 = arith.constant 0 : index
    %c0_6 = arith.constant 0 : index
    %7 = vector.load %arg4[%c0_5, %c0_6] : memref<128x4xf32, #tpu.memory_space<vmem>>, vector<128x4xf32>
    %cst_7 = arith.constant dense<0.000000e+00> : vector<2x4xf32>
    %8 = tpu.matmul %6, %7, %cst_7 {dimension_numbers = #tpu.dot_dimension_numbers<[1], [0], [0], [1], [0, 0, 1, 1], [], []>, precision = #tpu.contract_precision<fp32>} : vector<2x128xf32>, vector<128x4xf32>, vector<2x4xf32> -> vector<2x4xf32>
    %9 = math.sqrt %8 : vector<2x4xf32>
    %cst_8 = arith.constant 1.000000e+00 : f32
    %10 = vector.broadcast %cst_8 : f32 to vector<2x4xf32>
    %11 = arith.subf %10, %9 : vector<2x4xf32>
    %cst_9 = arith.constant 0.000000e+00 : f32
    %12 = vector.broadcast %cst_9 : f32 to vector<2x4xf32>
    %13 = arith.maximumf %11, %12 : vector<2x4xf32>
    %14 = arith.mulf %2, %8 : vector<2x4xf32>
    %cst_10 = arith.constant 1.000000e+00 : f32
    %15 = vector.broadcast %cst_10 : f32 to vector<2x4xf32>
    %16 = arith.subf %15, %2 : vector<2x4xf32>
    %17 = arith.mulf %16, %13 : vector<2x4xf32>
    %18 = arith.mulf %17, %13 : vector<2x4xf32>
    %19 = arith.addf %14, %18 : vector<2x4xf32>
    %20 = vector.shape_cast %19 : vector<2x4xf32> to vector<1x2x4xf32>
    %cst_11 = arith.constant dense<0.000000e+00> : vector<1xf32>
    %21 = vector.multi_reduction <add>, %20, %cst_11 [1, 2] : vector<1x2x4xf32> to vector<1xf32>
    %22 = vector.shape_cast %21 : vector<1xf32> to vector<1x1x1xf32>
    %23 = vector.extract %22[0, 0, 0] : f32 from vector<1x1x1xf32>
    %24 = vector.broadcast %23 : f32 to vector<1x8x128xf32>
    %c0_12 = arith.constant 0 : index
    %c0_13 = arith.constant 0 : index
    %c0_14 = arith.constant 0 : index
    %25 = vector.load %arg5[%c0_12, %c0_13, %c0_14] : memref<1x8x128xf32, #tpu.memory_space<vmem>>, vector<1x8x128xf32>
    tpu.vector_store %arg5[%c0_12, %c0_13, %c0_14], %24 {strides = array<i32>} : memref<1x8x128xf32, #tpu.memory_space<vmem>>, vector<1x8x128xf32>,
    return
  }
  func.func @transform_0(%arg0: i32) -> (i32, i32) {
    %c0_i32 = arith.constant 0 : i32
    %c0_i32_0 = arith.constant 0 : i32
    return %arg0, %c0_i32 : i32, i32
  }
  func.func @transform_1(%arg0: i32) -> (i32, i32) {
    %c0_i32 = arith.constant 0 : i32
    %c0_i32_0 = arith.constant 0 : i32
    return %arg0, %c0_i32 : i32, i32
  }
  func.func @transform_2(%arg0: i32) -> (i32, i32) {
    %c0_i32 = arith.constant 0 : i32
    %c0_i32_0 = arith.constant 0 : i32
    return %arg0, %c0_i32 : i32, i32
  }
  func.func @transform_3(%arg0: i32) -> (i32, i32) {
    %c0_i32 = arith.constant 0 : i32
    %c0_i32_0 = arith.constant 0 : i32
    %c0_i32_1 = arith.constant 0 : i32
    return %c0_i32, %c0_i32_0 : i32, i32
  }
  func.func @transform_4(%arg0: i32) -> (i32, i32, i32) {
    %c0_i32 = arith.constant 0 : i32
    %c0_i32_0 = arith.constant 0 : i32
    %c0_i32_1 = arith.constant 0 : i32
    return %arg0, %c0_i32, %c0_i32_0 : i32, i32, i32
  }
}

</mosaic_0001>

<bundles_post_ra>
// kernel: tpu_custom_call.1
= control target key start
LH: loop header
LB: loop body
LE: loop exit
PB: predicated region body
PF: predicated region fallthrough
CT: control target
= control target key end

     0   :  { %v1219_v3 = vmov 0.0|0.0   ;;  %vm1220_vm0 = vmmov 0   ;;  %v1221_v11 = vmov 0.0   ;;  %s1580_s0 = inlined_call_operand.vmem [shape: f32[2,128], index: 0, kind: input, shape index: {}]   ;;  %s1581_s1 = inlined_call_operand.vmem [shape: f32[2,128], index: 1, kind: input, shape index: {}]   ;;  %s1582_s2 = inlined_call_operand.vmem [shape: f32[2,4], index: 2, kind: input, shape index: {}]   ;;  %s1583_s3 = inlined_call_operand.vmem [shape: f32[128,4], index: 3, kind: input, shape index: {}]   ;;  %s1584_s4 = inlined_call_operand.hbm [shape: f32[1,8,128], index: 4, kind: output, shape index: {}]  }
   0x1   :  { %v24_v0 = vld [vmem:[%s1583_s3] sm:$0xff]  ;;  %v25_v1 = vld [vmem:[%s1583_s3 + $0x8] sm:$0xff]  ;;  %v26_v2 = vld [vmem:[%s1583_s3 + $0x10] sm:$0xff]  ;;  %1034 = vmatprep.subr.bf16.mxu1 %v1219_v3  ;;  %1106 = vmatprep.subr.bf16.mxu0 %v1219_v3 }
   0x2   :  { %v41_v4 = vand.u32 4294901760, %v24_v0  ;;  %v44_v5 = vand.u32 4294901760, %v25_v1  ;;  %v27_v6 = vld [vmem:[%s1583_s3 + $0x18] sm:$0xff]  ;;  %v47_v7 = vand.u32 4294901760, %v26_v2  ;;  %v1265_v9 = vld [vmem:[%s1583_s3 + $0x20] sm:$0xff]  ;;  %v1270_v10 = vld [vmem:[%s1583_s3 + $0x28] sm:$0xff]  ;;  %856 = vmatprep.mubr.msk.f32.mxu1 %vm1220_vm0, %v1221_v11  ;;  %961 = vmatprep.mubr.msk.f32.mxu0 %vm1220_vm0, %v1221_v11 }
   0x3   :  { %v50_v8 = vand.u32 4294901760, %v27_v6  ;;  %v53_v14 = vand.u32 4294901760, %v1265_v9  ;;  %v56_v15 = vand.u32 4294901760, %v1270_v10  ;;  %v1289_v16 = vld [vmem:[%s1583_s3 + $0x30] sm:$0xff]  ;;  %v1294_v17 = vld [vmem:[%s1583_s3 + $0x38] sm:$0xff] }
   0x4   :  { %v1276_v12 = vpack.c.bf16 %v44_v5, %v41_v4  ;;  %v18_v18 = vld [vmem:[%s1580_s0] sm:$0x3] }
   0x5   :  { %v1280_v13 = vpack.c.bf16 %v50_v8, %v47_v7  ;;  %v19_v19 = vld [vmem:[%s1581_s1] sm:$0x3] }
   0x6   :  { %1036 = vmatpush3.bf16.msra.mxu1 %v1276_v12  ;;  %1108 = vmatpush3.bf16.msra.mxu0 %v1276_v12 }
   0x7   :  { %1037 = vmatprep.subr.bf16.mxu1 %v1219_v3  ;;  %1109 = vmatprep.subr.bf16.mxu0 %v1219_v3 }
   0x8   :  { %9 = vsyncpa [#allocation3], 0  ;;  %v1304_v20 = vpack.c.bf16 %v56_v15, %v53_v14  ;;  %v59_v21 = vand.u32 4294901760, %v1289_v16  ;;  %v62_v22 = vand.u32 4294901760, %v1294_v17  ;;  %v1313_v23 = vld [vmem:[%s1583_s3 + $0x40] sm:$0xff]  ;;  %v1318_v24 = vld [vmem:[%s1583_s3 + $0x48] sm:$0xff]  ;;  %v21_v25 = vsub.f32 %v18_v18, %v19_v19 }
   0x9   :  { %v65_v28 = vand.u32 4294901760, %v1313_v23  ;;  %v68_v29 = vand.u32 4294901760, %v1318_v24  ;;  %v1331_v30 = vld [vmem:[%s1583_s3 + $0x50] sm:$0xff]  ;;  %v1336_v31 = vld [vmem:[%s1583_s3 + $0x58] sm:$0xff]  ;;  %v1338_v33 = vsub.f32 %v24_v0, %v41_v4  ;;  %v1342_v35 = vsub.f32 %v25_v1, %v44_v5  ;;  %v1353_v39 = vld [vmem:[%s1583_s3 + $0x60] sm:$0xff] }
   0xa   :  { %1039 = vmatpush3.bf16.msra.mxu1 %v1280_v13  ;;  %1111 = vmatpush3.bf16.msra.mxu0 %v1280_v13  ;;  %v22_v26 = vadd.f32 1e-06, %v21_v25  ;;  %v1322_v27 = vpack.c.bf16 %v62_v22, %v59_v21  ;;  %v71_v37 = vand.u32 4294901760, %v1331_v30  ;;  %v74_v38 = vand.u32 4294901760, %v1336_v31  ;;  %v1360_v40 = vld [vmem:[%s1583_s3 + $0x68] sm:$0xff]  ;;  %v1382_v47 = vld [vmem:[%s1583_s3 + $0x70] sm:$0xff] }
   0xb   :  { %1040 = vmatprep.subr.bf16.mxu1 %v1219_v3  ;;  %1112 = vmatprep.subr.bf16.mxu0 %v1219_v3  ;;  %v1346_v36 = vpack.c.bf16 %v68_v29, %v65_v28  ;;  %v1362_v41 = vsub.f32 %v26_v2, %v47_v7  ;;  %v1364_v42 = vsub.f32 %v27_v6, %v50_v8  ;;  %v77_v43 = vand.u32 4294901760, %v1353_v39  ;;  %v1387_v48 = vld [vmem:[%s1583_s3 + $0x78] sm:$0xff] }
   0xc   :  { %v23_v32 = vmul.f32 %v22_v26, %v22_v26  ;;  %v1376_v45 = vpack.c.bf16 %v74_v38, %v71_v37  ;;  %v80_v46 = vand.u32 4294901760, %v1360_v40  ;;  %v134_v49 = vand.u32 4294901760, %v1338_v33 }
   0xd   :  { %v141_v50 = vand.u32 4294901760, %v1342_v35  ;;  %v1394_v51 = vsub.f32 %v1265_v9, %v53_v14  ;;  %v1397_v52 = vsub.f32 %v1270_v10, %v56_v15  ;;  %v83_v53 = vand.u32 4294901760, %v1382_v47 }
   0xe   :  { %1042 = vmatpush3.bf16.msra.mxu1 %v1304_v20  ;;  %1114 = vmatpush3.bf16.msra.mxu0 %v1304_v20  ;;  %v1340_v34 = vand.u32 4294901760, %v23_v32  ;;  %v86_v54 = vand.u32 4294901760, %v1387_v48  ;;  %v148_v56 = vand.u32 4294901760, %v1362_v41  ;;  %v1409_v57 = vpack.c.bf16 %v80_v46, %v77_v43 }
   0xf   :  { %1043 = vmatprep.subr.bf16.mxu1 %v1219_v3  ;;  %1115 = vmatprep.subr.bf16.mxu0 %v1219_v3  ;;  %v135_v58 = vsub.f32 %v1338_v33, %v134_v49  ;;  %v142_v59 = vsub.f32 %v1342_v35, %v141_v50  ;;  %v155_v60 = vand.u32 4294901760, %v1364_v42  ;;  %v1417_v61 = vsub.f32 %v1289_v16, %v59_v21 }
  0x10   :  { %v1368_v44 = vsub.f32 %v23_v32, %v1340_v34  ;;  %v1420_v62 = vsub.f32 %v1294_v17, %v62_v22  ;;  %v149_v0 = vsub.f32 %v1362_v41, %v148_v56  ;;  %v162_v1 = vand.u32 4294901760, %v1394_v51 }
  0x11   :  { %v169_v2 = vand.u32 4294901760, %v1397_v52  ;;  %v1432_v4 = vpack.c.bf16 %v86_v54, %v83_v53  ;;  %v136_v5 = vand.u32 4294901760, %v135_v58  ;;  %v143_v6 = vand.u32 4294901760, %v142_v59 }
  0x12   :  { %1045 = vmatpush3.bf16.msra.mxu1 %v1322_v27  ;;  %1117 = vmatpush3.bf16.msra.mxu0 %v1322_v27  ;;  %v123_v55 = vand.u32 4294901760, %v1368_v44  ;;  %v156_v7 = vsub.f32 %v1364_v42, %v155_v60  ;;  %v1438_v8 = vsub.f32 %v1313_v23, %v65_v28  ;;  %v1441_v9 = vsub.f32 %v1318_v24, %v68_v29 }
  0x13   :  { %1046 = vmatprep.subr.bf16.mxu1 %v1219_v3  ;;  %1118 = vmatprep.subr.bf16.mxu0 %v1219_v3  ;;  %v1131_v10 = vpack.c.bf16 %v141_v50, %v134_v49  ;;  %v150_v15 = vand.u32 4294901760, %v149_v0  ;;  %v163_v16 = vsub.f32 %v1394_v51, %v162_v1  ;;  %v170_v17 = vsub.f32 %v1397_v52, %v169_v2 }
  0x14   :  { %v124_v63 = vsub.f32 %v1368_v44, %v123_v55  ;;  %v1059_v18 = vpack.c.bf16 %v143_v6, %v136_v5  ;;  %v157_v19 = vand.u32 4294901760, %v156_v7  ;;  %v176_v21 = vand.u32 4294901760, %v1417_v61 }
  0x15   :  { %v183_v22 = vand.u32 4294901760, %v1420_v62  ;;  %v1454_v23 = vsub.f32 %v1331_v30, %v71_v37  ;;  %v1459_v24 = vsub.f32 %v1336_v31, %v74_v38  ;;  %v1134_v25 = vpack.c.bf16 %v155_v60, %v148_v56 }
  0x16   :  { %1048 = vmatpush3.bf16.msra.mxu1 %v1346_v36  ;;  %1120 = vmatpush3.bf16.msra.mxu0 %v1346_v36  ;;  %v125_v14 = vand.u32 4294901760, %v124_v63  ;;  %v164_v26 = vand.u32 4294901760, %v163_v16  ;;  %v171_v28 = vand.u32 4294901760, %v170_v17  ;;  %v190_v29 = vand.u32 4294901760, %v1438_v8 }
  0x17   :  { %1049 = vmatprep.subr.bf16.mxu1 %v1219_v3  ;;  %1121 = vmatprep.subr.bf16.mxu0 %v1219_v3  ;;  %v1062_v32 = vpack.c.bf16 %v157_v19, %v150_v15  ;;  %v177_v49 = vsub.f32 %v1417_v61, %v176_v21  ;;  %v184_v30 = vsub.f32 %v1420_v62, %v183_v22  ;;  %v197_v37 = vand.u32 4294901760, %v1441_v9 }
  0x18   :  { %v1470_v31 = vsub.f32 %v1353_v39, %v77_v43  ;;  %v1475_v38 = vsub.f32 %v1360_v40, %v80_v46  ;;  %v1137_v50 = vpack.c.bf16 %v169_v2, %v162_v1  ;;  %v204_v56 = vand.u32 4294901760, %v1454_v23 }
  0x19   :  { %v211_v58 = vand.u32 4294901760, %v1459_v24  ;;  %v1065_v39 = vpack.c.bf16 %v171_v28, %v164_v26  ;;  %v178_v43 = vand.u32 4294901760, %v177_v49  ;;  %v185_v59 = vand.u32 4294901760, %v184_v30 }
  0x1a   :  { %1051 = vmatpush3.bf16.msra.mxu1 %v1376_v45  ;;  %1123 = vmatpush3.bf16.msra.mxu0 %v1376_v45  ;;  %v198_v40 = vsub.f32 %v1441_v9, %v197_v37  ;;  %v1490_v46 = vsub.f32 %v1382_v47, %v83_v53  ;;  %v1495_v60 = vsub.f32 %v1387_v48, %v86_v54  ;;  %v218_v7 = vand.u32 4294901760, %v1470_v31 }
  0x1b   :  { %1052 = vmatprep.subr.bf16.mxu1 %v1219_v3  ;;  %1124 = vmatprep.subr.bf16.mxu0 %v1219_v3  ;;  %v1140_v63 = vpack.c.bf16 %v183_v22, %v176_v21  ;;  %v205_v1 = vsub.f32 %v1454_v23, %v204_v56  ;;  %v212_v2 = vsub.f32 %v1459_v24, %v211_v58  ;;  %v225_v47 = vand.u32 4294901760, %v1475_v38 }
  0x1c   :  { %v1068_v5 = vpack.c.bf16 %v185_v59, %v178_v43  ;;  %v199_v6 = vand.u32 4294901760, %v198_v40  ;;  %v1143_v48 = vpack.c.bf16 %v197_v37, %v190_v29  ;;  %v219_v15 = vsub.f32 %v1470_v31, %v218_v7 }
  0x1d   :  { %v206_v53 = vand.u32 4294901760, %v205_v1  ;;  %v213_v54 = vand.u32 4294901760, %v212_v2  ;;  %v226_v16 = vsub.f32 %v1475_v38, %v225_v47  ;;  %v239_v17 = vand.u32 4294901760, %v1495_v60 }
  0x1e   :  { %1054 = vmatpush3.bf16.msra.mxu1 %v1409_v57  ;;  %1126 = vmatpush3.bf16.msra.mxu0 %v1409_v57  ;;  %v1146_v19 = vpack.c.bf16 %v211_v58, %v204_v56  ;;  %v220_v21 = vand.u32 4294901760, %v219_v15  ;;  %vm695_vm3 = vcmask 25600  }
  0x1f   :  { %1055 = vmatprep.subr.bf16.mxu1 %v1219_v3  ;;  %1127 = vmatprep.subr.bf16.mxu0 %v1219_v3  ;;  %v227_v22 = vand.u32 4294901760, %v226_v16  ;;  %v240_v26 = vsub.f32 %v1495_v60, %v239_v17 }
  0x21   :  { %v1077_v28 = vpack.c.bf16 %v227_v22, %v220_v21  ;;  %v241_v49 = vand.u32 4294901760, %v240_v26 }
  0x22   :  { %1057 = vmatpush3.bf16.msra.mxu1 %v1432_v4  ;;  %1129 = vmatpush3.bf16.msra.mxu0 %v1432_v4 }
  0x23   :  { %1058 = vmatprep.subr.bf16.mxu1 %v1219_v3  ;;  %1130 = vmatprep.subr.bf16.mxu0 %v1219_v3 }
  0x25   :  { %857 = vmatmul.mubr.f32.vlgmr.msra.gmra.mrb[0].mxu1 %v125_v14  ;;  %962 = vmatmul.mubr.f32.vlgmr.msra.gmra.mrb[0].mxu0 %v123_v55  ;;  %v191_v55 = vsub.f32 %v1438_v8, %v190_v29  ;;  %v1149_v29 = vpack.c.bf16 %v225_v47, %v218_v7 }
  0x26   :  { %1060 = vmatpush3.bf16.msra.mxu1 %v1059_v18  ;;  %1132 = vmatpush3.bf16.msra.mxu0 %v1131_v10  ;;  %v232_v10 = vand.u32 4294901760, %v1490_v46  ;;  %v1074_v18 = vpack.c.bf16 %v213_v54, %v206_v53 }
  0x27   :  { %1061 = vmatprep.subr.bf16.mxu1 %v1219_v3  ;;  %1133 = vmatprep.subr.bf16.mxu0 %v1219_v3  ;;  %v192_v0 = vand.u32 4294901760, %v191_v55  ;;  %v1086_v55 = vpack.c.bf16 %v1364_v42, %v1362_v41 }
  0x28   :  { %891 = vmatprep.mubr.msk.f32.mxu1 %vm1220_vm0, %v1221_v11  ;;  %996 = vmatprep.mubr.msk.f32.mxu0 %vm1220_vm0, %v1221_v11  ;;  %v1152_v37 = vpack.c.bf16 %v239_v17, %v232_v10 }
  0x29   :  { %v1071_v14 = vpack.c.bf16 %v199_v6, %v192_v0 }
  0x2a   :  { %1063 = vmatpush3.bf16.msra.mxu1 %v1062_v32  ;;  %1135 = vmatpush3.bf16.msra.mxu0 %v1134_v25  ;;  %v233_v25 = vsub.f32 %v1490_v46, %v232_v10 }
  0x2b   :  { %1064 = vmatprep.subr.bf16.mxu1 %v1219_v3  ;;  %1136 = vmatprep.subr.bf16.mxu0 %v1219_v3 }
  0x2c   :  { %v234_v32 = vand.u32 4294901760, %v233_v25 }
  0x2e   :  { %1066 = vmatpush3.bf16.msra.mxu1 %v1065_v39  ;;  %1138 = vmatpush3.bf16.msra.mxu0 %v1137_v50  ;;  %v1080_v30 = vpack.c.bf16 %v241_v49, %v234_v32  ;;  %v1083_v50 = vpack.c.bf16 %v1342_v35, %v1338_v33  ;;  %v1089_v33 = vpack.c.bf16 %v1397_v52, %v1394_v51 }
  0x2f   :  { %1067 = vmatprep.subr.bf16.mxu1 %v1219_v3  ;;  %1139 = vmatprep.subr.bf16.mxu0 %v1219_v3 }
  0x32   :  { %1069 = vmatpush3.bf16.msra.mxu1 %v1068_v5  ;;  %1141 = vmatpush3.bf16.msra.mxu0 %v1140_v63 }
  0x33   :  { %1070 = vmatprep.subr.bf16.mxu1 %v1219_v3  ;;  %1142 = vmatprep.subr.bf16.mxu0 %v1219_v3 }
  0x36   :  { %1072 = vmatpush3.bf16.msra.mxu1 %v1071_v14  ;;  %1144 = vmatpush3.bf16.msra.mxu0 %v1143_v48 }
  0x37   :  { %1073 = vmatprep.subr.bf16.mxu1 %v1219_v3  ;;  %1145 = vmatprep.subr.bf16.mxu0 %v1219_v3 }
  0x3a   :  { %1075 = vmatpush3.bf16.msra.mxu1 %v1074_v18  ;;  %1147 = vmatpush3.bf16.msra.mxu0 %v1146_v19 }
  0x3b   :  { %1076 = vmatprep.subr.bf16.mxu1 %v1219_v3  ;;  %1148 = vmatprep.subr.bf16.mxu0 %v1219_v3 }
  0x3e   :  { %1078 = vmatpush3.bf16.msra.mxu1 %v1077_v28  ;;  %1150 = vmatpush3.bf16.msra.mxu0 %v1149_v29 }
  0x3f   :  { %1079 = vmatprep.subr.bf16.mxu1 %v1219_v3  ;;  %1151 = vmatprep.subr.bf16.mxu0 %v1219_v3 }
  0x42   :  { %1081 = vmatpush3.bf16.msra.mxu1 %v1080_v30  ;;  %1153 = vmatpush3.bf16.msra.mxu0 %v1152_v37 }
  0x43   :  { %1082 = vmatprep.subr.bf16.mxu1 %v1219_v3  ;;  %1154 = vmatprep.subr.bf16.mxu0 %v1219_v3 }
  0x45   :  { %892 = vmatmul.mubr.f32.vlgmr.msra.gmra.mrb[0].mxu1 %v1340_v34  ;;  %997 = vmatmul.mubr.f32.vlgmr.msra.gmra.mrb[0].mxu0 %v1340_v34 }
  0x46   :  { %1084 = vmatpush3.bf16.msra.mxu1 %v1083_v50  ;;  %1156 = vmatpush3.bf16.msra.mxu0 %v1276_v12  ;;  %v1092_v12 = vpack.c.bf16 %v1420_v62, %v1417_v61 }
  0x47   :  { %1085 = vmatprep.subr.bf16.mxu1 %v1219_v3  ;;  %1157 = vmatprep.subr.bf16.mxu0 %v1219_v3 }
  0x48   :  { %926 = vmatprep.mubr.msk.f32.mxu1 %vm1220_vm0, %v1221_v11  ;;  %1031 = vmatprep.mubr.msk.f32.mxu0 %vm1220_vm0, %v1221_v11  ;;  %v1095_v11 = vpack.c.bf16 %v1441_v9, %v1438_v8 }
  0x4a   :  { %1087 = vmatpush3.bf16.msra.mxu1 %v1086_v55  ;;  %1159 = vmatpush3.bf16.msra.mxu0 %v1280_v13  ;;  %v1098_v13 = vpack.c.bf16 %v1459_v24, %v1454_v23 }
  0x4b   :  { %1088 = vmatprep.subr.bf16.mxu1 %v1219_v3  ;;  %1160 = vmatprep.subr.bf16.mxu0 %v1219_v3 }
  0x4e   :  { %1090 = vmatpush3.bf16.msra.mxu1 %v1089_v33  ;;  %1162 = vmatpush3.bf16.msra.mxu0 %v1304_v20  ;;  %v1101_v20 = vpack.c.bf16 %v1475_v38, %v1470_v31 }
  0x4f   :  { %1091 = vmatprep.subr.bf16.mxu1 %v1219_v3  ;;  %1163 = vmatprep.subr.bf16.mxu0 %v1219_v3 }
  0x52   :  { %1093 = vmatpush3.bf16.msra.mxu1 %v1092_v12  ;;  %1165 = vmatpush3.bf16.msra.mxu0 %v1322_v27  ;;  %v1104_v27 = vpack.c.bf16 %v1495_v60, %v1490_v46 }
  0x53   :  { %1094 = vmatprep.subr.bf16.mxu1 %v1219_v3  ;;  %1166 = vmatprep.subr.bf16.mxu0 %v1219_v3 }
  0x56   :  { %1096 = vmatpush3.bf16.msra.mxu1 %v1095_v11  ;;  %1168 = vmatpush3.bf16.msra.mxu0 %v1346_v36 }
  0x57   :  { %1097 = vmatprep.subr.bf16.mxu1 %v1219_v3  ;;  %1169 = vmatprep.subr.bf16.mxu0 %v1219_v3 }
  0x5a   :  { %1099 = vmatpush3.bf16.msra.mxu1 %v1098_v13  ;;  %1171 = vmatpush3.bf16.msra.mxu0 %v1376_v45 }
  0x5b   :  { %1100 = vmatprep.subr.bf16.mxu1 %v1219_v3  ;;  %1172 = vmatprep.subr.bf16.mxu0 %v1219_v3 }
  0x5e   :  { %1102 = vmatpush3.bf16.msra.mxu1 %v1101_v20  ;;  %1174 = vmatpush3.bf16.msra.mxu0 %v1409_v57 }
  0x5f   :  { %1103 = vmatprep.subr.bf16.mxu1 %v1219_v3  ;;  %1175 = vmatprep.subr.bf16.mxu0 %v1219_v3  ;;  %v20_v3 = vld [vmem:[%s1582_s2] sm:$0x3]  ;;  %s1222_s2 = smov [#allocation2]  }
  0x60   :  { %s714_s24 = sshll.u32 %s1222_s2, 4  ;;  %s715_s24 = int_to_ptr.vmem [resolvable:$true] %s714_s24 }
  0x61   :  { %s1195_s26 = scalar_lea.vmem %s715_s24, 128  ;;  %p1200_p1 = scmp.lt.s32.totalorder %s715_s24, %s715_s24 }
  0x62   :  { %1105 = vmatpush3.bf16.msra.mxu1 %v1104_v27  ;;  %1177 = vmatpush3.bf16.msra.mxu0 %v1432_v4  ;;  %v691_v4 = vsub.f32 1.0, %v20_v3  ;;  %p1196_p0 = scmp.ne.s32.totalorder %s715_s24, %s1195_s26  ;;  %p1201_p2 = scmp.lt.s32.totalorder %s1195_s26, %s1195_s26 }
  0x64   :  { %p1202_p3 = por %p1201_p2, %p1200_p1 }
  0x65   :  { %927 = vmatmul.mubr.f32.vlgmr.msra.gmra.mrb[0].mxu1 %v1368_v44  ;;  %1032 = vmatmul.mubr.f32.vlgmr.msra.gmra.mrb[0].mxu0 %v1340_v34 }
  0x66   :  { %p1203_p4 = pnand %p1202_p3, %p1196_p0 }
 0x138   :  { %v382_v35 = vpop.f32.mrb[0].mxu1  ;;  %v677_v36 = vpop.f32.mrb[0].mxu0 }
 0x139   :  { %v1178_v41 = vadd.f32 %v677_v36, %v382_v35  ;;  %v928_v42 = vpop.f32.mrb[1].mxu1  ;;  %v1033_v45 = vpop.f32.mrb[1].mxu0 }
 0x13b   :  { %1193 = vrsqrt.f32 %v1178_v41  ;;  %vm683_vm1 = vcmp.eq.f32.partialorder %v1178_v41, inf  ;;  %v686_v57 = vand.u32 2147483648, %v1178_v41  ;;  %vm685_vm2 = vcmp.eq.f32.partialorder %v1178_v41, 0.0 }
 0x13c   :  { %v690_v9 = vmul.f32 %v1178_v41, %v20_v3 }
 0x145   :  { %v1194_v51 = vpop.eup %1193 }
 0x146   :  { %v682_v52 = vmul.f32 %v1194_v51, %v1178_v41 }
 0x148   :  { %v684_v61 = vsel %vm683_vm1, %v1178_v41, %v682_v52 }
 0x149   :  { %v687_v62 = vsel %vm685_vm2, %v686_v57, %v684_v61 }
 0x14a   :  { %v688_v44 = vsub.f32 1.0, %v687_v62 }
 0x14c   :  { %v689_v34 = vmax.f32 %v688_v44, 0.0 }
 0x14e   :  { %v692_v8 = vmul.f32 %v691_v4, %v689_v34 }
 0x150   :  { %v693_v23 = vmul.f32 %v692_v8, %v689_v34 }
 0x152   :  { %v694_v24 = vadd.f32 %v693_v23, %v690_v9 }
 0x154   :  { %v696_v31 = vsel %vm695_vm3, %v694_v24, 0.0 }
 0x155   :  { %697 = vadd.xlane.f32.xlu0 %v696_v31 }
 0x1e2   :  { %v698_v38 = vpop.xlane.xlu0 %697 }
 0x1e3   :  { %v699_v56 = vrot.slane %v698_v38, 4 }
 0x1e5   :  { %v700_v58 = vadd.f32 %v699_v56, %v698_v38 }
 0x1e7   :  { %v701_v39 = vrot.slane %v700_v58, 2 }
 0x1e9   :  { %v702_v43 = vadd.f32 %v701_v39, %v700_v58 }
 0x1eb   :  { %v703_v59 = vrot.slane %v702_v43, 1 }
 0x1ed   :  { %v704_v40 = vadd.f32 %v703_v59, %v702_v43 }
 0x1ef   :  { %1187 = vpush %v704_v40 }
 0x220   :  { %s1188_s25 = spop %1187 }
 0x221   :  { %v706_v46 = vstv %s1188_s25 }
 0x222   :  { %707 = vst [vmem:[#allocation2] sm:$0xff] %v706_v46 }
 0x223   :  { %1206 = shalt.err (!%p1203_p4)
}
 0x224   :  { %s1207_s29 = scalar_lea.hbm %s1584_s4, 128 }
 0x225   :  { %p1208_p5 = scmp.ne.s32.totalorder %s1584_s4, %s1207_s29  ;;  %p1211_p6 = scmp.lt.u32.totalorder %s1207_s29, %s1584_s4 }
 0x227   :  { %p1213_p7 = pnand %p1211_p6, %p1208_p5 }
 0x229   :  { %1216 = shalt.err (!%p1213_p7)
}
 0x22a   :  { %717 = dma.vmem_to_hbm [thread:$0]  %s715_s24, 128, %s1584_s4, [#allocation3]  }
 0x22b   :  { %1217 = dma.done.wait [#allocation3], 128  }
 0x22c   :  { %1218 = vsyncadd [#allocation3], 4294967168 }
 0x22d   :  { %721 = vsyncpa [#allocation3], 1 }

</bundles_post_ra>
